<compile_context>
chip_gen: v6e
topology: v6e:2x2x1
jax: 0.10.0
libtpu: 0.0.40
codegen_flags: <defaults>
</compile_context>

<pallas_src>
import functools
import math

import jax
import jax.numpy as jnp
from jax.experimental import pallas as pl
from jax.experimental.pallas import tpu as pltpu


# ----------------------------------------------------------------------------
# Pallas kernels
# ----------------------------------------------------------------------------
def _pick_tile(m):
    for t in (256, 128, 64, 32, 16, 8):
        if m % t == 0:
            return t
    return m


def _matmul_kernel(a_ref, b_ref, bias_ref, *rest, scale, apply_silu, has_res):
    if has_res:
        res_ref, o_ref = rest
    else:
        (o_ref,) = rest
    y = jnp.dot(a_ref[...].astype(jnp.bfloat16), b_ref[...],
                preferred_element_type=jnp.float32)
    y = y + bias_ref[...]
    if has_res:
        y = y + res_ref[...]
    if scale != 1.0:
        y = y * scale
    if apply_silu:
        y = y * jax.nn.sigmoid(y)
    o_ref[...] = y


def pallas_matmul_bias(a, w, bias, residual=None, scale=1.0, apply_silu=False):
    """(M,K)f32 @ (K,N)bf16 + bias, optional fused residual / scale / SiLU."""
    M, K = a.shape
    N = w.shape[1]
    TM = _pick_tile(M)
    has_res = residual is not None
    in_specs = [pl.BlockSpec((TM, K), lambda i: (i, 0)),
                pl.BlockSpec((K, N), lambda i: (0, 0)),
                pl.BlockSpec((1, N), lambda i: (0, 0))]
    args = [a, w, bias]
    if has_res:
        in_specs.append(pl.BlockSpec((TM, N), lambda i: (i, 0)))
        args.append(residual)
    kern = functools.partial(_matmul_kernel, scale=scale,
                             apply_silu=apply_silu, has_res=has_res)
    return pl.pallas_call(
        kern,
        out_shape=jax.ShapeDtypeStruct((M, N), jnp.float32),
        grid=(M // TM,),
        in_specs=in_specs,
        out_specs=pl.BlockSpec((TM, N), lambda i: (i, 0)),
        compiler_params=pltpu.CompilerParams(dimension_semantics=("parallel",)),
    )(*args)


def _conv3x3_kernel(x_ref, w_ref, bias_ref, *rest, H, W, Cin, Cout, scale, has_res):
    if has_res:
        res_ref, o_ref = rest
    else:
        (o_ref,) = rest
    acc = jnp.zeros((H * W, Cout), jnp.float32)
    for di in range(3):
        for dj in range(3):
            patch = x_ref[0, di:di + H, dj:dj + W, :]            # (H, W, Cin)
            patch = patch.reshape(H * W, Cin).astype(jnp.bfloat16)
            wk = w_ref[di * 3 + dj]                              # (Cin, Cout) bf16
            acc = acc + jnp.dot(patch, wk, preferred_element_type=jnp.float32)
    y = acc + bias_ref[...]
    if has_res:
        y = y + res_ref[0].reshape(H * W, Cout)
    if scale != 1.0:
        y = y * scale
    o_ref[0] = y.reshape(H, W, Cout)


def pallas_conv3x3(xp, w_mat, bias, residual=None, scale=1.0):
    """3x3 'same' conv on padded NHWC input; im2col done in VMEM (9 dots)."""
    N, Hp, Wp, Cin = xp.shape
    H, W = Hp - 2, Wp - 2
    Cout = w_mat.shape[-1]
    has_res = residual is not None
    in_specs = [pl.BlockSpec((1, Hp, Wp, Cin), lambda i: (i, 0, 0, 0)),
                pl.BlockSpec((9, Cin, Cout), lambda i: (0, 0, 0)),
                pl.BlockSpec((1, Cout), lambda i: (0, 0))]
    args = [xp, w_mat, bias]
    if has_res:
        in_specs.append(pl.BlockSpec((1, H, W, Cout), lambda i: (i, 0, 0, 0)))
        args.append(residual)
    kern = functools.partial(_conv3x3_kernel, H=H, W=W, Cin=Cin, Cout=Cout,
                             scale=scale, has_res=has_res)
    return pl.pallas_call(
        kern,
        out_shape=jax.ShapeDtypeStruct((N, H, W, Cout), jnp.float32),
        grid=(N,),
        in_specs=in_specs,
        out_specs=pl.BlockSpec((1, H, W, Cout), lambda i: (i, 0, 0, 0)),
        compiler_params=pltpu.CompilerParams(dimension_semantics=("parallel",)),
    )(*args)


def _groupnorm_kernel(x_ref, w_ref, b_ref, o_ref, *, G, eps, apply_silu):
    x = x_ref[0].astype(jnp.float32)                  # (HW, C)
    HW, C = x.shape
    Cg = C // G
    inv_cnt = 1.0 / float(HW * Cg)
    # group-assignment matrices built from iota (no extra HBM traffic)
    gmat = (jax.lax.broadcasted_iota(jnp.int32, (C, G), 0) // Cg
            == jax.lax.broadcasted_iota(jnp.int32, (C, G), 1)).astype(jnp.float32)
    gmat_t = (jax.lax.broadcasted_iota(jnp.int32, (G, C), 1) // Cg
              == jax.lax.broadcasted_iota(jnp.int32, (G, C), 0)).astype(jnp.float32)
    s1 = jnp.sum(x, axis=0, keepdims=True)                                   # (1, C)
    mean_g = jnp.dot(s1, gmat, preferred_element_type=jnp.float32) * inv_cnt  # (1, G)
    mean_c = jnp.dot(mean_g, gmat_t, preferred_element_type=jnp.float32)      # (1, C)
    xc = x - mean_c
    s2 = jnp.sum(xc * xc, axis=0, keepdims=True)                             # (1, C)
    var_g = jnp.dot(s2, gmat, preferred_element_type=jnp.float32) * inv_cnt
    rstd_g = jax.lax.rsqrt(var_g + eps)
    rstd_c = jnp.dot(rstd_g, gmat_t, preferred_element_type=jnp.float32)
    y = xc * rstd_c * w_ref[0] + b_ref[0]
    if apply_silu:
        y = y * jax.nn.sigmoid(y)
    o_ref[0] = y


def _attention_kernel(q_ref, k_ref, v_ref, o_ref, *, scale):
    q = q_ref[...].astype(jnp.bfloat16)     # (B, L, ch)
    k = k_ref[...].astype(jnp.bfloat16)
    v = v_ref[...].astype(jnp.bfloat16)
    s = jnp.einsum('blc,bmc->blm', q, k,
                   preferred_element_type=jnp.float32) * scale
    s = s - jnp.max(s, axis=-1, keepdims=True)
    p = jnp.exp(s)
    p = p * pl.reciprocal(jnp.sum(p, axis=-1, keepdims=True), approx=True)
    o_ref[...] = jnp.einsum('blm,bmc->blc', p.astype(jnp.bfloat16), v,
                            preferred_element_type=jnp.float32)


def pallas_attention(q, k, v):
    """All head-batches in one grid step (lane-dense, no per-head launch)."""
    B, L, ch = q.shape
    kern = functools.partial(_attention_kernel, scale=1.0 / math.sqrt(ch))
    return pl.pallas_call(
        kern,
        out_shape=jax.ShapeDtypeStruct((B, L, ch), jnp.float32),
        grid=(1,),
        in_specs=[pl.BlockSpec((B, L, ch), lambda i: (0, 0, 0)) for _ in range(3)],
        out_specs=pl.BlockSpec((B, L, ch), lambda i: (0, 0, 0)),
        compiler_params=pltpu.CompilerParams(dimension_semantics=("parallel",)),
    )(q, k, v)


# ----------------------------------------------------------------------------
# Layer forwards (thin JAX glue, NHWC)
# ----------------------------------------------------------------------------
def _resample(x, up, down):
    if up:
        # conv_transpose2d with [[1,1],[1,1]] filter, stride 2 == nearest x2
        x = jnp.repeat(jnp.repeat(x, 2, axis=1), 2, axis=2)
    if down:
        # conv2d with [[.25,.25],[.25,.25]] filter, stride 2 == 2x2 avg pool
        N, H, W, C = x.shape
        x = x.reshape(N, H // 2, 2, W // 2, 2, C).mean(axis=(2, 4))
    return x


def conv3x3_fwd(p, x, up=False, down=False, residual=None, scale=1.0):
    x = _resample(x, up, down)
    xp = jnp.pad(x, ((0, 0), (1, 1), (1, 1), (0, 0)))
    return pallas_conv3x3(xp, p["w"], p["b"], residual=residual, scale=scale)


def conv1x1_fwd(p, x, residual=None, scale=1.0):
    N, H, W, Cin = x.shape
    res = None if residual is None else residual.reshape(N * H * W, -1)
    y = pallas_matmul_bias(x.reshape(N * H * W, Cin), p["w"], p["b"],
                           residual=res, scale=scale)
    return y.reshape(N, H, W, -1)


def skip_fwd(p, x, up=False, down=False):
    x = _resample(x, up, down)
    if p["w"] is None:          # kernel=0 skip: resample only
        return x
    return conv1x1_fwd(p, x)


def linear_fwd(p, x, apply_silu=False):
    return pallas_matmul_bias(x, p["w"], p["b"], apply_silu=apply_silu)


def groupnorm_fwd(gn, x, apply_silu=False, scale=None, shift=None, eps=1e-5):
    N, H, W, C = x.shape
    G = min(32, C // 4)           # num_groups=32, min_channels_per_group=4
    gamma = gn["w"][None, :]
    beta = gn["b"][None, :]
    if scale is not None:
        # y = silu(shift + GN(x) * scale)  with  GN(x) = xhat * gamma + beta
        eff_w = gamma * scale
        eff_b = beta * scale + shift
    else:
        eff_w = jnp.broadcast_to(gamma, (N, C))
        eff_b = jnp.broadcast_to(beta, (N, C))
    x2 = x.reshape(N, H * W, C)
    kern = functools.partial(_groupnorm_kernel, G=G, eps=eps, apply_silu=apply_silu)
    y = pl.pallas_call(
        kern,
        out_shape=jax.ShapeDtypeStruct((N, H * W, C), jnp.float32),
        grid=(N,),
        in_specs=[pl.BlockSpec((1, H * W, C), lambda i: (i, 0, 0)),
                  pl.BlockSpec((1, 1, C), lambda i: (i, 0, 0)),
                  pl.BlockSpec((1, 1, C), lambda i: (i, 0, 0))],
        out_specs=pl.BlockSpec((1, H * W, C), lambda i: (i, 0, 0)),
        compiler_params=pltpu.CompilerParams(dimension_semantics=("parallel",)),
    )(x2, eff_w.reshape(N, 1, C), eff_b.reshape(N, 1, C))
    return y.reshape(N, H, W, C)


def positional_embedding(x, num_channels, max_positions=10000):
    half = num_channels // 2
    freqs = jnp.arange(half, dtype=jnp.float32) / half
    freqs = (1.0 / max_positions) ** freqs
    h = x[:, None] * freqs[None, :]
    return jnp.concatenate([jnp.cos(h), jnp.sin(h)], axis=1)


# ----------------------------------------------------------------------------
# Parameter construction (deterministic synthetic init; weights stored bf16
# in the kernel-ready layouts, converted ONCE at init)
# ----------------------------------------------------------------------------
class KeyGen:
    def __init__(self, key):
        self._key = key

    def __call__(self):
        self._key, sub = jax.random.split(self._key)
        return sub


def init_linear(kg, fin, fout):
    w = jax.random.normal(kg(), (fout, fin), jnp.float32) / math.sqrt(fin)
    b = jax.random.normal(kg(), (fout,), jnp.float32) * 0.1
    return {"w": jnp.asarray(w.T, jnp.bfloat16), "b": b.reshape(1, fout)}


def init_conv(kg, cin, cout, kernel):
    if kernel == 0:
        return {"w": None, "b": None}
    w = jax.random.normal(kg(), (cout, cin, kernel, kernel), jnp.float32)
    w = w / math.sqrt(cin * kernel * kernel)
    b = jax.random.normal(kg(), (cout,), jnp.float32) * 0.1
    if kernel == 1:
        wm = w.reshape(cout, cin).T                               # (Cin, Cout)
    else:  # 3x3 -> (9, Cin, Cout): tap index = di*3 + dj
        wm = jnp.transpose(w, (2, 3, 1, 0)).reshape(kernel * kernel, cin, cout)
    return {"w": jnp.asarray(wm, jnp.bfloat16), "b": b.reshape(1, cout)}


def init_groupnorm(c):
    return {"w": jnp.ones((c,), jnp.float32), "b": jnp.zeros((c,), jnp.float32)}


def make_unet_block(kg, cin, cout, emb_ch, *, up=False, down=False,
                    attention=False, channels_per_head=64):
    num_heads = 0 if not attention else cout // channels_per_head
    p = dict(kind="block", in_channels=cin, out_channels=cout,
             up=up, down=down, num_heads=num_heads, skip_scale=1.0)
    p["norm0"] = init_groupnorm(cin)
    p["conv0"] = init_conv(kg, cin, cout, 3)
    p["affine"] = init_linear(kg, emb_ch, cout * 2)   # adaptive_scale=True
    p["norm1"] = init_groupnorm(cout)
    p["conv1"] = init_conv(kg, cout, cout, 3)
    p["skip"] = None
    if cout != cin or up or down:
        kernel = 1 if cout != cin else 0              # resample_proj=False
        p["skip"] = init_conv(kg, cin, cout, kernel)
    if num_heads:
        p["norm2"] = init_groupnorm(cout)
        p["qkv"] = init_conv(kg, cout, cout * 3, 1)
        p["proj"] = init_conv(kg, cout, cout, 1)
    return p


def build_unet(key, cfg):
    kg = KeyGen(key)
    mc = cfg["model_channels"]
    emb_ch = mc * cfg["channel_mult_emb"]
    cph = cfg["channels_per_head"]

    params = dict(cfg=cfg)
    l0, l1 = init_linear(kg, mc, emb_ch), init_linear(kg, emb_ch, emb_ch)
    l0s, l1s = init_linear(kg, mc, emb_ch), init_linear(kg, emb_ch, emb_ch)
    # t / s map layers fused (stacked along N) so each layer is one batched matmul.
    params["map0_w"] = jnp.concatenate([l0["w"], l0s["w"]], axis=1)
    params["map0_b"] = jnp.concatenate([l0["b"], l0s["b"]], axis=1)
    params["map1_w"] = jnp.concatenate([l1["w"], l1s["w"]], axis=1)
    params["map1_b"] = jnp.concatenate([l1["b"], l1s["b"]], axis=1)

    enc = []
    cout = cfg["in_channels"]
    for level, mult in enumerate(cfg["channel_mult"]):
        res = cfg["img_resolution"] >> level
        if level == 0:
            cin, cout = cout, mc * mult
            enc.append(dict(kind="conv", out_channels=cout,
                            params=init_conv(kg, cin, cout, 3)))
        else:
            enc.append(make_unet_block(kg, cout, cout, emb_ch, down=True,
                                       channels_per_head=cph))
        for _ in range(cfg["num_blocks"]):
            cin, cout = cout, mc * mult
            enc.append(make_unet_block(kg, cin, cout, emb_ch,
                                       attention=(res in cfg["attn_resolutions"]),
                                       channels_per_head=cph))
    skips = [b["out_channels"] for b in enc]

    dec = []
    for level, mult in reversed(list(enumerate(cfg["channel_mult"]))):
        res = cfg["img_resolution"] >> level
        if level == len(cfg["channel_mult"]) - 1:
            dec.append(make_unet_block(kg, cout, cout, emb_ch, attention=True,
                                       channels_per_head=cph))
            dec.append(make_unet_block(kg, cout, cout, emb_ch,
                                       channels_per_head=cph))
        else:
            dec.append(make_unet_block(kg, cout, cout, emb_ch, up=True,
                                       channels_per_head=cph))
        for _ in range(cfg["num_blocks"] + 1):
            cin = cout + skips.pop()
            cout = mc * mult
            dec.append(make_unet_block(kg, cin, cout, emb_ch,
                                       attention=(res in cfg["attn_resolutions"]),
                                       channels_per_head=cph))
    params["enc"] = enc
    params["dec"] = dec
    params["out_norm"] = init_groupnorm(cout)
    params["out_conv"] = init_conv(kg, cout, cfg["out_channels"], 3)
    return params


# ----------------------------------------------------------------------------
# Model forward
# ----------------------------------------------------------------------------
def unet_block_fwd(p, x, emb):
    orig = x
    h = groupnorm_fwd(p["norm0"], x, apply_silu=True)
    h = conv3x3_fwd(p["conv0"], h, up=p["up"], down=p["down"])
    aff = linear_fwd(p["affine"], emb)                       # (N, 2*Cout)
    scale, shift = jnp.split(aff, 2, axis=1)
    h = groupnorm_fwd(p["norm1"], h, apply_silu=True,
                      scale=scale + 1.0, shift=shift)
    # dropout(p=0.1) is identity in eval mode.
    if p["skip"] is not None:
        sk = skip_fwd(p["skip"], orig, up=p["up"], down=p["down"])
    else:
        sk = orig
    # conv1 with the residual add + skip_scale fused into the kernel epilogue
    h = conv3x3_fwd(p["conv1"], h, residual=sk, scale=p["skip_scale"])

    if p["num_heads"]:
        heads = p["num_heads"]
        N, H, W, C = h.shape
        ch = C // heads
        y = groupnorm_fwd(p["norm2"], h, apply_silu=False)
        qkv = conv1x1_fwd(p["qkv"], y)                        # (N, H, W, 3C)
        # same channel decomposition as torch: 3C -> (heads, ch, 3)
        qkv = qkv.reshape(N, H * W, heads, ch, 3)
        q = qkv[..., 0].transpose(0, 2, 1, 3).reshape(N * heads, H * W, ch)
        k = qkv[..., 1].transpose(0, 2, 1, 3).reshape(N * heads, H * W, ch)
        v = qkv[..., 2].transpose(0, 2, 1, 3).reshape(N * heads, H * W, ch)
        a = pallas_attention(q, k, v)                         # (N*heads, HW, ch)
        a = a.reshape(N, heads, H * W, ch).transpose(0, 2, 1, 3).reshape(N * H * W, C)
        # proj 1x1 with the residual add + skip_scale fused into the matmul
        out = pallas_matmul_bias(a, p["proj"]["w"], p["proj"]["b"],
                                 residual=h.reshape(N * H * W, C),
                                 scale=p["skip_scale"])
        h = out.reshape(N, H, W, C)
    return h


def dhariwal_unet_fwd(params, x_nchw, noise_labels_t, noise_labels_s):
    cfg = params["cfg"]
    mc = cfg["model_channels"]
    emb_ch = mc * cfg["channel_mult_emb"]
    B = x_nchw.shape[0]

    # embedding path: t and s mapping layers share one batched matmul per layer
    pos_t = positional_embedding(noise_labels_t, mc)
    pos_s = positional_embedding(noise_labels_s, mc)
    a0 = jnp.concatenate([pos_t, pos_s], axis=0)                     # (2B, mc)
    y0 = pallas_matmul_bias(a0, params["map0_w"], params["map0_b"],
                            apply_silu=True)                         # (2B, 2E)
    a1 = jnp.concatenate([y0[:B, :emb_ch], y0[B:, emb_ch:]], axis=0)
    y1 = pallas_matmul_bias(a1, params["map1_w"], params["map1_b"])
    emb = jax.nn.silu(y1[:B, :emb_ch] + y1[B:, emb_ch:])

    x = jnp.transpose(x_nchw, (0, 2, 3, 1))                          # NCHW -> NHWC
    skips = []
    for blk in params["enc"]:
        if blk["kind"] == "conv":
            x = conv3x3_fwd(blk["params"], x)
        else:
            x = unet_block_fwd(blk, x, emb)
        skips.append(x)
    for blk in params["dec"]:
        if x.shape[-1] != blk["in_channels"]:
            x = jnp.concatenate([x, skips.pop()], axis=-1)
        x = unet_block_fwd(blk, x, emb)
    x = groupnorm_fwd(params["out_norm"], x, apply_silu=True)
    x = conv3x3_fwd(params["out_conv"], x)
    return jnp.transpose(x, (0, 3, 1, 2))                            # NHWC -> NCHW


# ----------------------------------------------------------------------------
# Main
# ----------------------------------------------------------------------------
if __name__ == "__main__":
    CFG = dict(
        img_resolution=16,
        in_channels=4,
        out_channels=4,
        model_channels=32,      # small, but >= channels_per_head at attn levels
        channel_mult=[1, 2],
        channel_mult_emb=2,
        num_blocks=1,
        attn_resolutions=[8],
        channels_per_head=64,
    )

    key = jax.random.PRNGKey(0)
    kx, kt, ks, kp = jax.random.split(key, 4)
    x = jax.random.normal(kx, (2, 4, 16, 16), jnp.float32)
    noise_t = jax.random.normal(kt, (2,), jnp.float32)
    noise_s = jax.random.normal(ks, (2,), jnp.float32)

    params = build_unet(kp, CFG)
    out = dhariwal_unet_fwd(params, x, noise_t, noise_s)
    out = jax.block_until_ready(out)
    assert out.shape == (2, 4, 16, 16), out.shape
    assert bool(jnp.all(jnp.isfinite(out)))
    print("KERNEL_OK")
</pallas_src>

<mosaic_0001>
module attributes {stable_mosaic.version = 11 : i64} {
  func.func @_matmul_kernel(%arg0: i32, %arg1: memref<4x32xf32, #tpu.memory_space<vmem>>, %arg2: memref<32x128xbf16, #tpu.memory_space<vmem>>, %arg3: memref<1x128xf32, #tpu.memory_space<vmem>>, %arg4: memref<4x128xf32, #tpu.memory_space<vmem>>) attributes {dimension_semantics = [#tpu.dimension_semantics<parallel>], iteration_bounds = array<i64: 1>, scalar_prefetch = 0 : i64, scratch_operands = 0 : i64, tpu.core_type = #tpu.core_type<tc>, window_params = [{transform_indices = @transform_0, window_bounds = array<i64: 4, 32>}, {pipeline_mode = #tpu.pipeline_mode<synchronous>, transform_indices = @transform_1, window_bounds = array<i64: 32, 128>}, {pipeline_mode = #tpu.pipeline_mode<synchronous>, transform_indices = @transform_2, window_bounds = array<i64: 1, 128>}, {transform_indices = @transform_3, window_bounds = array<i64: 4, 128>}]} {
    %c0 = arith.constant 0 : index
    %c0_0 = arith.constant 0 : index
    %0 = vector.load %arg1[%c0, %c0_0] : memref<4x32xf32, #tpu.memory_space<vmem>>, vector<4x32xf32>
    %1 = arith.truncf %0 : vector<4x32xf32> to vector<4x32xbf16>
    %c0_1 = arith.constant 0 : index
    %c0_2 = arith.constant 0 : index
    %2 = vector.load %arg2[%c0_1, %c0_2] : memref<32x128xbf16, #tpu.memory_space<vmem>>, vector<32x128xbf16>
    %cst = arith.constant dense<0.000000e+00> : vector<4x128xf32>
    %3 = tpu.matmul %1, %2, %cst {dimension_numbers = #tpu.dot_dimension_numbers<[1], [0], [0], [1], [0, 0, 1, 1], [], []>} : vector<4x32xbf16>, vector<32x128xbf16>, vector<4x128xf32> -> vector<4x128xf32>
    %c0_3 = arith.constant 0 : index
    %c0_4 = arith.constant 0 : index
    %4 = vector.load %arg3[%c0_3, %c0_4] : memref<1x128xf32, #tpu.memory_space<vmem>>, vector<1x128xf32>
    %5 = vector.broadcast %4 : vector<1x128xf32> to vector<4x128xf32>
    %6 = arith.addf %3, %5 : vector<4x128xf32>
    %7 = arith.negf %6 : vector<4x128xf32>
    %8 = math.exp %7 : vector<4x128xf32>
    %cst_5 = arith.constant 1.000000e+00 : f32
    %9 = vector.broadcast %cst_5 : f32 to vector<4x128xf32>
    %10 = arith.addf %9, %8 : vector<4x128xf32>
    %11 = arith.divf %9, %10 : vector<4x128xf32>
    %12 = arith.mulf %6, %11 : vector<4x128xf32>
    %c0_6 = arith.constant 0 : index
    %c0_7 = arith.constant 0 : index
    %13 = vector.load %arg4[%c0_6, %c0_7] : memref<4x128xf32, #tpu.memory_space<vmem>>, vector<4x128xf32>
    tpu.vector_store %arg4[%c0_6, %c0_7], %12 {strides = array<i32>} : memref<4x128xf32, #tpu.memory_space<vmem>>, vector<4x128xf32>,
    return
  }
  func.func @transform_0(%arg0: i32) -> (i32, i32) {
    %c0_i32 = arith.constant 0 : i32
    %c0_i32_0 = arith.constant 0 : i32
    return %arg0, %c0_i32 : i32, i32
  }
  func.func @transform_1(%arg0: i32) -> (i32, i32) {
    %c0_i32 = arith.constant 0 : i32
    %c0_i32_0 = arith.constant 0 : i32
    %c0_i32_1 = arith.constant 0 : i32
    return %c0_i32, %c0_i32_0 : i32, i32
  }
  func.func @transform_2(%arg0: i32) -> (i32, i32) {
    %c0_i32 = arith.constant 0 : i32
    %c0_i32_0 = arith.constant 0 : i32
    %c0_i32_1 = arith.constant 0 : i32
    return %c0_i32, %c0_i32_0 : i32, i32
  }
  func.func @transform_3(%arg0: i32) -> (i32, i32) {
    %c0_i32 = arith.constant 0 : i32
    %c0_i32_0 = arith.constant 0 : i32
    return %arg0, %c0_i32 : i32, i32
  }
}

</mosaic_0001>

<bundles_post_ra>
// kernel: tpu_custom_call.1
= control target key start
LH: loop header
LB: loop body
LE: loop exit
PB: predicated region body
PF: predicated region fallthrough
CT: control target
= control target key end

     0   :  { %8 = vsyncpa [#allocation3], 0  ;;  %s269_s0 = inlined_call_operand.hbm [shape: f32[4,32], index: 0, kind: input, shape index: {}]   ;;  %s270_s1 = inlined_call_operand.hbm [shape: bf16[32,128], index: 1, kind: input, shape index: {}]   ;;  %s271_s2 = inlined_call_operand.vmem [shape: f32[1,128], index: 2, kind: input, shape index: {}]   ;;  %s272_s3 = inlined_call_operand.hbm [shape: f32[4,128], index: 3, kind: output, shape index: {}]  }
   0x1   :  { %9 = vsyncpa [#allocation6], 0 }
   0x2   :  { %10 = vsyncpa [#allocation4], 0  ;;  %s230_s12 = smov [#allocation2]   ;;  %s231_s14 = smov [#allocation5]  }
   0x3   :  { %s17_s13 = sshll.u32 %s230_s12, 4  ;;  %s26_s15 = sshll.u32 %s231_s14, 4  ;;  %s18_s13 = int_to_ptr.vmem [resolvable:$true] %s17_s13  ;;  %s27_s15 = int_to_ptr.vmem [resolvable:$true] %s26_s15 }
   0x4   :  { %s172_s16 = scalar_lea.vmem %s18_s13, 64  ;;  %p177_p1 = scmp.lt.s32.totalorder %s18_s13, %s18_s13 }
   0x5   :  { %p173_p0 = scmp.ne.s32.totalorder %s18_s13, %s172_s16  ;;  %p178_p2 = scmp.lt.s32.totalorder %s172_s16, %s172_s16 }
   0x7   :  { %p179_p3 = por %p178_p2, %p177_p1 }
   0x9   :  { %p180_p4 = pnand %p179_p3, %p173_p0 }
   0xb   :  { %183 = shalt.err (!%p180_p4)
}
   0xc   :  { %20 = dma.hbm_to_vmem [thread:$0]  %s269_s0, 64, %s18_s13, [#allocation3]  }
   0xd   :  { %s192_s19 = scalar_lea.vmem %s27_s15, 256  ;;  %p197_p6 = scmp.lt.s32.totalorder %s27_s15, %s27_s15 }
   0xe   :  { %p193_p5 = scmp.ne.s32.totalorder %s27_s15, %s192_s19  ;;  %p198_p7 = scmp.lt.s32.totalorder %s192_s19, %s192_s19 }
  0x10   :  { %p199_p8 = por %p198_p7, %p197_p6 }
  0x12   :  { %p200_p9 = pnand %p199_p8, %p193_p5 }
  0x14   :  { %203 = shalt.err (!%p200_p9)
}
  0x15   :  { %s232_s20 = smov 64   ;;  %s233_s21 = smov 4  }
  0x16   :  { %32 = dma.hbm_to_vmem [thread:$0]  %s270_s1, 256, %s27_s15, [#allocation6], %s232_s20, %s232_s20, %s233_s21  }
  0x17   :  { %224 = dma.done.wait [#allocation3], 64  }
  0x18   :  { %225 = vsyncadd [#allocation3], 4294967232 }
  0x19   :  { %226 = dma.done.wait [#allocation6], 256  }
  0x1a   :  { %227 = vsyncadd [#allocation6], 4294967040  ;;  %v234_v0 = vmov 0.0   ;;  %vm235_vm0 = vmmov 0   ;;  %v158_v1 = vld [vmem:[#allocation5 + $0x8] sm:$0xff]   ;;  %v159_v2 = vld [vmem:[#allocation5] sm:$0xff]  }
  0x1b   :  { %143 = vmatprep.subr.bf16.mxu0 %v234_v0  ;;  %147 = vmatprep.mubr.msk.bf16.mxu0 %vm235_vm0, %v234_v0  ;;  %v42_v3 = vld [vmem:[#allocation2] sm:$0xf]  ;;  %vm67_vm1 = vcmask 261120   ;;  %s236_s1 = smov [#allocation7]  }
  0x1c   :  { %144 = vmatpush3.bf16.msra.mxu0 %v158_v1  ;;  %v43_v4 = vpack.c.bf16 %v42_v3, %v42_v3  ;;  %v135_v5 = vld [vmem:[%s271_s2] ss:$0 sm:$0xff]  ;;  %s125_s25 = sshll.u32 %s236_s1, 4  ;;  %s126_s25 = int_to_ptr.vmem [resolvable:$true] %s125_s25 }
  0x1d   :  { %145 = vmatprep.subr.bf16.mxu0 %v234_v0  ;;  %s204_s26 = scalar_lea.vmem %s126_s25, 64  ;;  %p209_p11 = scmp.lt.s32.totalorder %s126_s25, %s126_s25 }
  0x1e   :  { %p205_p10 = scmp.ne.s32.totalorder %s126_s25, %s204_s26  ;;  %p210_p12 = scmp.lt.s32.totalorder %s204_s26, %s204_s26 }
  0x20   :  { %146 = vmatpush3.bf16.msra.mxu0 %v159_v2  ;;  %p211_p13 = por %p210_p12, %p209_p11 }
  0x22   :  { %p212_p0 = pnand %p211_p13, %p205_p10 }
  0x23   :  { %148 = vmatmul.mubr.msk.bf16.vlgmr.msra.gmra.mxu0 %vm67_vm1, %v43_v4 }
  0xe3   :  { %v105_v6 = vpop.f32.mrf.mxu0 }
  0xe4   :  { %v106_v7 = vadd.f32 %v135_v5, %v105_v6 }
  0xe5   :  { %v149_v8 = vpop.f32.mrf.mxu0 }
  0xe6   :  { %v139_v9 = vmul.f32 -1.442695, %v106_v7 }
  0xe7   :  { %v108_v10 = vpop.f32.mrf.mxu0 }
  0xe8   :  { %160 = vpow2.f32 %v139_v9 }
  0xe9   :  { %v150_v11 = vpop.f32.mrf.mxu0 }
  0xf5   :  { %v161_v12 = vpop.eup %160 }
  0xf6   :  { %v114_v13 = vadd.f32 1.0, %v161_v12 }
  0xf8   :  { %162 = vrcp.f32 %v114_v13 }
 0x105   :  { %v163_v14 = vpop.eup %162 }
 0x106   :  { %v117_v15 = vmul.f32 %v163_v14, %v106_v7 }
 0x108   :  { %118 = vst [vmem:[#allocation7] sm:$0xf] %v117_v15 }
 0x109   :  { %215 = shalt.err (!%p212_p0)
}
 0x10a   :  { %128 = dma.vmem_to_hbm [thread:$0]  %s126_s25, 64, %s272_s3, [#allocation4]  }
 0x10b   :  { %228 = dma.done.wait [#allocation4], 64  }
 0x10c   :  { %229 = vsyncadd [#allocation4], 4294967232 }
 0x10d   :  { %132 = vsyncpa [#allocation3], 1 }
 0x10e   :  { %133 = vsyncpa [#allocation6], 1 }
 0x10f   :  { %134 = vsyncpa [#allocation4], 1 }

</bundles_post_ra>
